<compile_context>
chip_gen: v6e
topology: v6e:2x2x1
jax: 0.10.0
libtpu: 0.0.40
codegen_flags: <defaults>
</compile_context>

<pallas_src>
import functools
import math

import jax
import jax.numpy as jnp
from jax import lax
from jax.experimental import pallas as pl
from jax.experimental.pallas import tpu as pltpu


_VMEM_LIMIT = 48 * 1024 * 1024


# ----------------------------------------------------------------------------
# Tiled matmul kernels (every 1x1 conv / linear projection in the model)
# ----------------------------------------------------------------------------
def _mm_bias_single_kernel(x_ref, w_ref, b_ref, o_ref):
    acc = jnp.dot(x_ref[...], w_ref[...], preferred_element_type=jnp.float32)
    o_ref[...] = (acc + b_ref[...]).astype(o_ref.dtype)


def _mm_bias_res_single_kernel(x_ref, w_ref, b_ref, r_ref, o_ref):
    acc = jnp.dot(x_ref[...], w_ref[...], preferred_element_type=jnp.float32)
    o_ref[...] = (acc + b_ref[...]
                  + r_ref[...].astype(jnp.float32)).astype(o_ref.dtype)


def _mm_bias_kernel(x_ref, w_ref, b_ref, o_ref, acc_ref):
    @pl.when(pl.program_id(2) == 0)
    def _():
        acc_ref[...] = jnp.zeros_like(acc_ref)

    acc_ref[...] += jnp.dot(x_ref[...], w_ref[...],
                            preferred_element_type=jnp.float32)

    @pl.when(pl.program_id(2) == pl.num_programs(2) - 1)
    def _():
        o_ref[...] = (acc_ref[...] + b_ref[...]).astype(o_ref.dtype)


def _mm_bias_res_kernel(x_ref, w_ref, b_ref, r_ref, o_ref, acc_ref):
    @pl.when(pl.program_id(2) == 0)
    def _():
        acc_ref[...] = jnp.zeros_like(acc_ref)

    acc_ref[...] += jnp.dot(x_ref[...], w_ref[...],
                            preferred_element_type=jnp.float32)

    @pl.when(pl.program_id(2) == pl.num_programs(2) - 1)
    def _():
        o_ref[...] = (acc_ref[...] + b_ref[...]
                      + r_ref[...].astype(jnp.float32)).astype(o_ref.dtype)


def _pick_tile(dim, candidates=(512, 256, 128)):
    for c in candidates:
        if dim % c == 0:
            return c
    return dim          # full-extent block (always a legal block shape)


def pallas_linear(x, w, b, residual=None, out_dtype=jnp.float32):
    """(M, K) @ (K, N) + b [+ residual], tiled + pipelined on the MXU."""
    M, K = x.shape
    K2, N = w.shape
    assert K == K2 and b.shape == (N,)
    tm, tk, tn = _pick_tile(M), _pick_tile(K), _pick_tile(N)
    b2 = b.reshape(1, N).astype(jnp.float32)
    compiler_2d = pltpu.CompilerParams(
        dimension_semantics=("parallel", "parallel"),
        vmem_limit_bytes=_VMEM_LIMIT)
    compiler_3d = pltpu.CompilerParams(
        dimension_semantics=("parallel", "parallel", "arbitrary"),
        vmem_limit_bytes=_VMEM_LIMIT)

    if tk == K:
        # Fast path: K fits one tile -> no accumulator scratch, no K grid axis.
        grid = (M // tm, N // tn)
        in_specs = [pl.BlockSpec((tm, K), lambda i, j: (i, 0)),
                    pl.BlockSpec((K, tn), lambda i, j: (0, j)),
                    pl.BlockSpec((1, tn), lambda i, j: (0, j))]
        args = [x, w, b2]
        if residual is None:
            kernel = _mm_bias_single_kernel
        else:
            assert residual.shape == (M, N)
            in_specs.append(pl.BlockSpec((tm, tn), lambda i, j: (i, j)))
            args.append(residual)
            kernel = _mm_bias_res_single_kernel
        return pl.pallas_call(
            kernel,
            out_shape=jax.ShapeDtypeStruct((M, N), out_dtype),
            grid=grid,
            in_specs=in_specs,
            out_specs=pl.BlockSpec((tm, tn), lambda i, j: (i, j)),
            compiler_params=compiler_2d,
        )(*args)

    # General path: K-tiled reduction with a VMEM f32 accumulator.
    grid = (M // tm, N // tn, K // tk)
    in_specs = [pl.BlockSpec((tm, tk), lambda i, j, k: (i, k)),
                pl.BlockSpec((tk, tn), lambda i, j, k: (k, j)),
                pl.BlockSpec((1, tn), lambda i, j, k: (0, j))]
    args = [x, w, b2]
    if residual is None:
        kernel = _mm_bias_kernel
    else:
        assert residual.shape == (M, N)
        in_specs.append(pl.BlockSpec((tm, tn), lambda i, j, k: (i, j)))
        args.append(residual)
        kernel = _mm_bias_res_kernel

    return pl.pallas_call(
        kernel,
        out_shape=jax.ShapeDtypeStruct((M, N), out_dtype),
        grid=grid,
        in_specs=in_specs,
        out_specs=pl.BlockSpec((tm, tn), lambda i, j, k: (i, j)),
        scratch_shapes=[pltpu.VMEM((tm, tn), jnp.float32)],
        compiler_params=compiler_3d,
    )(*args)


# ----------------------------------------------------------------------------
# QKV attention kernels (QKVAttention semantics)
# ----------------------------------------------------------------------------
def _attn_single_kernel(q_ref, k_ref, v_ref, o_ref, *, scale):
    # Whole KV sequence in one tile: one-shot softmax, no running stats.
    q = q_ref[0]                       # (tq, dh)  bf16
    k = k_ref[0]                       # (T,  dh)  bf16
    v = v_ref[0]                       # (T,  dh)  bf16
    s = lax.dot_general(q, k, (((1,), (1,)), ((), ())),
                        preferred_element_type=jnp.float32) * scale
    m = jnp.max(s, axis=-1, keepdims=True)
    p = jnp.exp(s - m)                                        # f32 softmax math
    l = jnp.sum(p, axis=-1, keepdims=True)
    acc = jnp.dot(p.astype(v.dtype), v, preferred_element_type=jnp.float32)
    o_ref[0] = (acc * pl.reciprocal(l, approx=True)).astype(o_ref.dtype)


def _flash_attn_kernel(q_ref, k_ref, v_ref, o_ref, m_ref, l_ref, acc_ref, *,
                       scale):
    ki = pl.program_id(3)

    @pl.when(ki == 0)
    def _():
        m_ref[...] = jnp.full_like(m_ref, -jnp.inf)
        l_ref[...] = jnp.zeros_like(l_ref)
        acc_ref[...] = jnp.zeros_like(acc_ref)

    q = q_ref[0]                       # (tq, dh)  bf16
    k = k_ref[0]                       # (tkv, dh) bf16
    v = v_ref[0]                       # (tkv, dh) bf16
    # einsum('td,sd->ts'): contract the head dim directly, no in-kernel k.T.
    s = lax.dot_general(q, k, (((1,), (1,)), ((), ())),
                        preferred_element_type=jnp.float32) * scale
    m_prev = m_ref[...]
    m_new = jnp.maximum(m_prev, jnp.max(s, axis=-1, keepdims=True))
    alpha = jnp.exp(m_prev - m_new)
    p = jnp.exp(s - m_new)                                   # f32 softmax math
    l_ref[...] = alpha * l_ref[...] + jnp.sum(p, axis=-1, keepdims=True)
    acc_ref[...] = alpha * acc_ref[...] + jnp.dot(
        p.astype(v.dtype), v, preferred_element_type=jnp.float32)
    m_ref[...] = m_new

    @pl.when(ki == pl.num_programs(3) - 1)
    def _():
        o_ref[0] = (acc_ref[...] *
                    pl.reciprocal(l_ref[...], approx=True)).astype(o_ref.dtype)


def pallas_qkv_attention(qkv, num_heads):
    """qkv: (B, T, 3C) with per-head channel layout [q_h | k_h | v_h] blocks
    of width dh = C / heads (exactly the reshape(b*H, 3c/H, T) split used by
    QKVAttention).  Returns (B, T, C).  Head split/merge happens purely in the
    BlockSpec index maps."""
    B, T, C3 = qkv.shape
    C = C3 // 3
    dh = C // num_heads
    assert dh * num_heads == C
    assert dh % 128 == 0, "head dim must be a multiple of 128 for lane-sliced blocks"
    assert T % 8 == 0, "sequence length must be a multiple of 8 (sublanes)"
    scale = 1.0 / math.sqrt(dh)        # == (dh**-0.25) applied to both q and k

    if T <= 512:
        # Entire KV sequence in one tile -> one-shot softmax kernel.
        tq = T if T <= 256 else _pick_tile(T, (256, 128))
        grid = (B, num_heads, T // tq)
        return pl.pallas_call(
            functools.partial(_attn_single_kernel, scale=scale),
            out_shape=jax.ShapeDtypeStruct((B, T, C), qkv.dtype),
            grid=grid,
            in_specs=[
                pl.BlockSpec((1, tq, dh), lambda b, h, qi: (b, qi, 3 * h)),
                pl.BlockSpec((1, T, dh), lambda b, h, qi: (b, 0, 3 * h + 1)),
                pl.BlockSpec((1, T, dh), lambda b, h, qi: (b, 0, 3 * h + 2)),
            ],
            out_specs=pl.BlockSpec((1, tq, dh), lambda b, h, qi: (b, qi, h)),
            compiler_params=pltpu.CompilerParams(
                dimension_semantics=("parallel", "parallel", "parallel"),
                vmem_limit_bytes=_VMEM_LIMIT),
        )(qkv, qkv, qkv)

    # General flash-style path with an online softmax over a KV reduction axis.
    tq = _pick_tile(T, (256, 128))
    tkv = _pick_tile(T, (256, 128))
    grid = (B, num_heads, T // tq, T // tkv)
    return pl.pallas_call(
        functools.partial(_flash_attn_kernel, scale=scale),
        out_shape=jax.ShapeDtypeStruct((B, T, C), qkv.dtype),
        grid=grid,
        in_specs=[
            pl.BlockSpec((1, tq, dh), lambda b, h, qi, ki: (b, qi, 3 * h)),
            pl.BlockSpec((1, tkv, dh), lambda b, h, qi, ki: (b, ki, 3 * h + 1)),
            pl.BlockSpec((1, tkv, dh), lambda b, h, qi, ki: (b, ki, 3 * h + 2)),
        ],
        out_specs=pl.BlockSpec((1, tq, dh), lambda b, h, qi, ki: (b, qi, h)),
        scratch_shapes=[pltpu.VMEM((tq, 1), jnp.float32),
                        pltpu.VMEM((tq, 1), jnp.float32),
                        pltpu.VMEM((tq, dh), jnp.float32)],
        compiler_params=pltpu.CompilerParams(
            dimension_semantics=("parallel", "parallel", "parallel", "arbitrary"),
            vmem_limit_bytes=_VMEM_LIMIT),
    )(qkv, qkv, qkv)


def qkv_attention_ref(qkv, num_heads):
    """Plain-JAX QKVAttention (same math, same bf16 MXU casts) for checking."""
    B, T, C3 = qkv.shape
    C = C3 // 3
    dh = C // num_heads
    scale = 1.0 / math.sqrt(dh)
    qkv5 = qkv.reshape(B, T, num_heads, 3, dh)
    q, k, v = qkv5[:, :, :, 0], qkv5[:, :, :, 1], qkv5[:, :, :, 2]
    logits = jnp.einsum('bthd,bshd->bhts', q, k,
                        preferred_element_type=jnp.float32) * scale
    w = jax.nn.softmax(logits, axis=-1)
    out = jnp.einsum('bhts,bshd->bthd', w.astype(v.dtype), v,
                     preferred_element_type=jnp.float32)
    return out.reshape(B, T, C).astype(qkv.dtype)


# ----------------------------------------------------------------------------
# Glue ops kept in XLA (see TODO(synk) at the top)
# ----------------------------------------------------------------------------
def silu(x):
    return x * jax.nn.sigmoid(x)


def conv3d(x, w, b, stride=1, padding=1):
    out = lax.conv_general_dilated(
        x, w, window_strides=(stride,) * 3, padding=[(padding, padding)] * 3,
        dimension_numbers=('NDHWC', 'DHWIO', 'NDHWC'))
    return out + b


def upsample_nearest2x(x):
    x = jnp.repeat(x, 2, axis=1)
    x = jnp.repeat(x, 2, axis=2)
    return jnp.repeat(x, 2, axis=3)


def layer_norm_spatial(x, gamma, beta, eps=1e-5):
    # torch.nn.LayerNorm([sp, sp, sp]) on [N, C, sp, sp, sp]: normalize each
    # (n, c) slice over the spatial dims; affine params shaped [sp, sp, sp].
    mean = jnp.mean(x, axis=(1, 2, 3), keepdims=True)
    var = jnp.var(x, axis=(1, 2, 3), keepdims=True)
    xn = (x - mean) * lax.rsqrt(var + eps)
    return xn * gamma[None, :, :, :, None] + beta[None, :, :, :, None]


def group_norm(x, gamma, beta, groups=32, eps=1e-5):
    # normalization(channels) == GroupNorm(32, channels) (guided-diffusion).
    N, T, C = x.shape
    xg = x.reshape(N, T, groups, C // groups)
    mean = jnp.mean(xg, axis=(1, 3), keepdims=True)
    var = jnp.var(xg, axis=(1, 3), keepdims=True)
    xn = ((xg - mean) * lax.rsqrt(var + eps)).reshape(N, T, C)
    return xn * gamma + beta


# ----------------------------------------------------------------------------
# Parameter constructors (synthetic weights; zero_module init replaced by
# random weights so the forward is non-trivial)
# ----------------------------------------------------------------------------
def _conv3_params(key, cin, cout):
    kw, kb = jax.random.split(key)
    w = jax.random.normal(kw, (3, 3, 3, cin, cout), jnp.float32) / math.sqrt(27 * cin)
    b = jax.random.normal(kb, (cout,), jnp.float32) * 0.02
    return {'w': w, 'b': b}


def _lin_params(key, cin, cout):
    kw, kb = jax.random.split(key)
    w = jax.random.normal(kw, (cin, cout), jnp.float32) / math.sqrt(cin)
    b = jax.random.normal(kb, (cout,), jnp.float32) * 0.02
    return {'w': w, 'b': b}


def _ln_params(key, sp):
    kg, kb = jax.random.split(key)
    return {'g': 1.0 + 0.1 * jax.random.normal(kg, (sp, sp, sp), jnp.float32),
            'b': 0.1 * jax.random.normal(kb, (sp, sp, sp), jnp.float32)}


def _gn_params(key, c):
    kg, kb = jax.random.split(key)
    return {'g': 1.0 + 0.1 * jax.random.normal(kg, (c,), jnp.float32),
            'b': 0.1 * jax.random.normal(kb, (c,), jnp.float32)}


# ----------------------------------------------------------------------------
# MyUNetModel forward (dims=3, as implied by LayerNorm([sp, sp, sp]))
# ----------------------------------------------------------------------------
class MyUNetModelPallas:
    def __init__(self, in_channels, model_channels, out_channels, num_res_blocks,
                 attention_resolutions, spatial_size, dropout=0.0,
                 channel_mult=(1, 2), conv_resample=True, num_heads=1,
                 key=jax.random.PRNGKey(0)):
        assert conv_resample, "only the conv_resample=True path is implemented"
        del dropout                                   # inference: identity
        key_iter = iter(jax.random.split(key, 256))

        def nk():
            return next(key_iter)

        def res_block(ch, sp, out_ch):
            return {'kind': 'res', 'out_ch': out_ch,
                    'ln1': _ln_params(nk(), sp),
                    'conv1': _conv3_params(nk(), ch, out_ch),
                    'ln2': _ln_params(nk(), sp),
                    'conv2': _conv3_params(nk(), out_ch, out_ch),
                    'skip': None if out_ch == ch else _lin_params(nk(), ch, out_ch)}

        def attn_block(ch, heads):
            return {'kind': 'attn', 'heads': heads,
                    'norm': _gn_params(nk(), ch),
                    'qkv': _lin_params(nk(), ch, 3 * ch),   # fused Q|K|V projection
                    'proj': _lin_params(nk(), ch, ch)}

        num_heads_upsample = num_heads

        self.input_blocks = [[{'kind': 'conv3',
                               **_conv3_params(nk(), in_channels, model_channels)}]]
        input_block_chans = [model_channels]
        input_block_sizes = [spatial_size]
        ch = model_channels
        ds = 1
        current_sp = spatial_size
        for level, mult in enumerate(channel_mult):
            for _ in range(num_res_blocks):
                layers = [res_block(ch, current_sp, mult * model_channels)]
                ch = mult * model_channels
                if ds in attention_resolutions:
                    layers.append(attn_block(ch, num_heads))
                self.input_blocks.append(layers)
                input_block_chans.append(ch)
            if level != len(channel_mult) - 1:
                self.input_blocks.append([{'kind': 'down',
                                           'conv': _conv3_params(nk(), ch, ch)}])
                input_block_chans.append(ch)
                input_block_sizes.append(current_sp)
                ds *= 2
                current_sp = (current_sp + 1) // 2

        self.middle_block = [res_block(ch, current_sp, ch),
                             attn_block(ch, num_heads),
                             res_block(ch, current_sp, ch)]

        self.output_blocks = []
        for level, mult in list(enumerate(channel_mult))[::-1]:
            for i in range(num_res_blocks + 1):
                layers = [res_block(ch + input_block_chans.pop(), current_sp,
                                    model_channels * mult)]
                ch = model_channels * mult
                if ds in attention_resolutions:
                    layers.append(attn_block(ch, num_heads_upsample))
                if level and i == num_res_blocks:
                    layers.append({'kind': 'up',
                                   'conv': _conv3_params(nk(), ch, ch)})
                    ds //= 2
                    current_sp = input_block_sizes.pop()
                self.output_blocks.append(layers)

        self.out_ln = _ln_params(nk(), current_sp)
        self.out_conv = _conv3_params(nk(), model_channels, out_channels)

    # ---------------- layers ----------------
    def _res(self, p, x, use_pallas):
        h = silu(layer_norm_spatial(x, p['ln1']['g'], p['ln1']['b']))
        h = conv3d(h, p['conv1']['w'], p['conv1']['b'])
        h = silu(layer_norm_spatial(h, p['ln2']['g'], p['ln2']['b']))
        h = conv3d(h, p['conv2']['w'], p['conv2']['b'])   # dropout(p=0) == id
        if p['skip'] is None:
            skip = x
        else:
            N, D, H, W, C = x.shape
            xf = x.reshape(N * D * H * W, C).astype(jnp.bfloat16)
            wb = p['skip']['w'].astype(jnp.bfloat16)
            if use_pallas:
                s = pallas_linear(xf, wb, p['skip']['b'], out_dtype=jnp.float32)
            else:
                s = (jnp.dot(xf, wb, preferred_element_type=jnp.float32)
                     + p['skip']['b'])
            skip = s.reshape(N, D, H, W, p['out_ch'])
        return skip + h

    def _attn(self, p, x, use_pallas):
        N, D, H, W, C = x.shape
        T = D * H * W
        xf = x.reshape(N, T, C)
        xn = group_norm(xf, p['norm']['g'], p['norm']['b'])
        xn2 = xn.reshape(N * T, C).astype(jnp.bfloat16)
        wqkv = p['qkv']['w'].astype(jnp.bfloat16)
        if use_pallas:
            qkv = pallas_linear(xn2, wqkv, p['qkv']['b'], out_dtype=jnp.bfloat16)
        else:
            qkv = (jnp.dot(xn2, wqkv, preferred_element_type=jnp.float32)
                   + p['qkv']['b']).astype(jnp.bfloat16)
        qkv = qkv.reshape(N, T, 3 * C)
        if use_pallas:
            a = pallas_qkv_attention(qkv, p['heads'])
        else:
            a = qkv_attention_ref(qkv, p['heads'])
        wproj = p['proj']['w'].astype(jnp.bfloat16)
        res = xf.reshape(N * T, C)                  # residual: pre-norm x (f32)
        if use_pallas:
            h = pallas_linear(a.reshape(N * T, C), wproj, p['proj']['b'],
                              residual=res, out_dtype=jnp.float32)
        else:
            h = (jnp.dot(a.reshape(N * T, C), wproj,
                         preferred_element_type=jnp.float32)
                 + p['proj']['b'] + res)
        return h.reshape(N, D, H, W, C)

    def _layer(self, p, h, use_pallas):
        kind = p['kind']
        if kind == 'conv3':
            return conv3d(h, p['w'], p['b'])
        if kind == 'down':
            return conv3d(h, p['conv']['w'], p['conv']['b'], stride=2)
        if kind == 'up':
            return conv3d(upsample_nearest2x(h), p['conv']['w'], p['conv']['b'])
        if kind == 'res':
            return self._res(p, h, use_pallas)
        if kind == 'attn':
            return self._attn(p, h, use_pallas)
        raise ValueError(kind)

    def __call__(self, x, use_pallas=True):
        # x: [N, C, D, H, W] (PyTorch layout) -> internally NDHWC.
        h = jnp.transpose(x, (0, 2, 3, 4, 1)).astype(jnp.float32)
        hs = []
        for layers in self.input_blocks:
            for p in layers:
                h = self._layer(p, h, use_pallas)
            hs.append(h)
        for p in self.middle_block:
            h = self._layer(p, h, use_pallas)
        for layers in self.output_blocks:
            skip = hs.pop()
            if skip.shape[3] < h.shape[3]:          # size(-1) in NCDHW
                h = h[:, :, :, :-1, :]
            if skip.shape[2] < h.shape[2]:          # size(-2)
                h = h[:, :, :-1, :, :]
            if skip.shape[1] < h.shape[1]:          # size(-3)
                h = h[:, :-1, :, :, :]
            h = jnp.concatenate([h, skip], axis=-1)
            for p in layers:
                h = self._layer(p, h, use_pallas)
        h = silu(layer_norm_spatial(h, self.out_ln['g'], self.out_ln['b']))
        h = conv3d(h, self.out_conv['w'], self.out_conv['b'])
        return jnp.transpose(h, (0, 4, 1, 2, 3))


if __name__ == "__main__":
    key = jax.random.PRNGKey(0)
    kx, kp = jax.random.split(key)

    # Small but TPU-friendly config: every channel width is a multiple of 128
    # (lane-dense blocks / full-width stores); attention runs at ds=2 and in
    # the middle block with channels=256, heads=2 -> head dim=128.
    B, C_in, S = 2, 4, 8
    model = MyUNetModelPallas(
        in_channels=C_in, model_channels=128, out_channels=C_in,
        num_res_blocks=1, attention_resolutions={2}, spatial_size=S,
        channel_mult=(1, 2), conv_resample=True, num_heads=2, key=kp)

    x = jax.random.normal(kx, (B, C_in, S, S, S), jnp.float32)

    out = jax.block_until_ready(model(x, use_pallas=True))
    ref = jax.block_until_ready(model(x, use_pallas=False))

    assert out.shape == (B, C_in, S, S, S), out.shape
    err = float(jnp.max(jnp.abs(out - ref)))
    assert err < 5e-2, f"max abs err = {err}"
    print("KERNEL_OK")
</pallas_src>

<mosaic_0001>
module attributes {stable_mosaic.version = 11 : i64} {
  func.func @_mm_bias_single_kernel(%arg0: i32, %arg1: i32, %arg2: memref<128x128xbf16, #tpu.memory_space<vmem>>, %arg3: memref<128x256xbf16, #tpu.memory_space<vmem>>, %arg4: memref<1x256xf32, #tpu.memory_space<vmem>>, %arg5: memref<128x256xf32, #tpu.memory_space<vmem>>) attributes {dimension_semantics = [#tpu.dimension_semantics<parallel>, #tpu.dimension_semantics<parallel>], iteration_bounds = array<i64: 1, 1>, scalar_prefetch = 0 : i64, scratch_operands = 0 : i64, tpu.core_type = #tpu.core_type<tc>, window_params = [{transform_indices = @transform_0, window_bounds = array<i64: 128, 128>}, {transform_indices = @transform_1, window_bounds = array<i64: 128, 256>}, {transform_indices = @transform_2, window_bounds = array<i64: 1, 256>}, {transform_indices = @transform_3, window_bounds = array<i64: 128, 256>}]} {
    %c0 = arith.constant 0 : index
    %c0_0 = arith.constant 0 : index
    %0 = vector.load %arg2[%c0, %c0_0] : memref<128x128xbf16, #tpu.memory_space<vmem>>, vector<128x128xbf16>
    %c0_1 = arith.constant 0 : index
    %c0_2 = arith.constant 0 : index
    %1 = vector.load %arg3[%c0_1, %c0_2] : memref<128x256xbf16, #tpu.memory_space<vmem>>, vector<128x256xbf16>
    %cst = arith.constant dense<0.000000e+00> : vector<128x256xf32>
    %2 = tpu.matmul %0, %1, %cst {dimension_numbers = #tpu.dot_dimension_numbers<[1], [0], [0], [1], [0, 0, 1, 1], [], []>} : vector<128x128xbf16>, vector<128x256xbf16>, vector<128x256xf32> -> vector<128x256xf32>
    %c0_3 = arith.constant 0 : index
    %c0_4 = arith.constant 0 : index
    %3 = vector.load %arg4[%c0_3, %c0_4] : memref<1x256xf32, #tpu.memory_space<vmem>>, vector<1x256xf32>
    %4 = vector.broadcast %3 : vector<1x256xf32> to vector<128x256xf32>
    %5 = arith.addf %2, %4 : vector<128x256xf32>
    %c0_5 = arith.constant 0 : index
    %c0_6 = arith.constant 0 : index
    %6 = vector.load %arg5[%c0_5, %c0_6] : memref<128x256xf32, #tpu.memory_space<vmem>>, vector<128x256xf32>
    tpu.vector_store %arg5[%c0_5, %c0_6], %5 {strides = array<i32>} : memref<128x256xf32, #tpu.memory_space<vmem>>, vector<128x256xf32>,
    return
  }
  func.func @transform_0(%arg0: i32, %arg1: i32) -> (i32, i32) {
    %c0_i32 = arith.constant 0 : i32
    %c0_i32_0 = arith.constant 0 : i32
    return %arg0, %c0_i32 : i32, i32
  }
  func.func @transform_1(%arg0: i32, %arg1: i32) -> (i32, i32) {
    %c0_i32 = arith.constant 0 : i32
    %c0_i32_0 = arith.constant 0 : i32
    return %c0_i32, %arg1 : i32, i32
  }
  func.func @transform_2(%arg0: i32, %arg1: i32) -> (i32, i32) {
    %c0_i32 = arith.constant 0 : i32
    %c0_i32_0 = arith.constant 0 : i32
    return %c0_i32, %arg1 : i32, i32
  }
  func.func @transform_3(%arg0: i32, %arg1: i32) -> (i32, i32) {
    %c0_i32 = arith.constant 0 : i32
    return %arg0, %arg1 : i32, i32
  }
}

</mosaic_0001>

<bundles_post_ra>
// kernel: tpu_custom_call.1
= control target key start
LH: loop header
LB: loop body
LE: loop exit
PB: predicated region body
PF: predicated region fallthrough
CT: control target
= control target key end

     0   :  { %8 = vsyncpa [#allocation3], 0  ;;  %s613_s0 = inlined_call_operand.hbm [shape: bf16[128,128], index: 0, kind: input, shape index: {}]   ;;  %s614_s1 = inlined_call_operand.hbm [shape: bf16[128,256], index: 1, kind: input, shape index: {}]   ;;  %s615_s2 = inlined_call_operand.vmem [shape: f32[1,256], index: 2, kind: input, shape index: {}]   ;;  %s616_s3 = inlined_call_operand.hbm [shape: f32[128,256], index: 3, kind: output, shape index: {}]  }
   0x1   :  { %9 = vsyncpa [#allocation6], 0 }
   0x2   :  { %10 = vsyncpa [#allocation4], 0  ;;  %s527_s12 = smov [#allocation2]  }
   0x3   :  { %s16_s13 = sshll.u32 %s527_s12, 4  ;;  %s17_s13 = int_to_ptr.vmem [resolvable:$true] %s16_s13 }
   0x4   :  { %s469_s14 = scalar_lea.vmem %s17_s13, 1024  ;;  %p474_p1 = scmp.lt.s32.totalorder %s17_s13, %s17_s13 }
   0x5   :  { %p470_p0 = scmp.ne.s32.totalorder %s17_s13, %s469_s14  ;;  %p475_p2 = scmp.lt.s32.totalorder %s469_s14, %s469_s14 }
   0x7   :  { %p476_p3 = por %p475_p2, %p474_p1 }
   0x9   :  { %p477_p4 = pnand %p476_p3, %p470_p0 }
   0xb   :  { %480 = shalt.err (!%p477_p4)
}
   0xc   :  { %s528_s15 = smov 64   ;;  %s529_s16 = smov 4  }
   0xd   :  { %22 = dma.hbm_to_vmem [thread:$0]  %s613_s0, 1024, %s17_s13, [#allocation3], %s528_s15, %s528_s15, %s529_s16  }
   0xe   :  { %s530_s19 = smov [#allocation5]  }
   0xf   :  { %s28_s20 = sshll.u32 %s530_s19, 4  ;;  %s29_s20 = int_to_ptr.vmem [resolvable:$true] %s28_s20 }
  0x10   :  { %s489_s21 = scalar_lea.vmem %s29_s20, 2048  ;;  %p494_p6 = scmp.lt.s32.totalorder %s29_s20, %s29_s20 }
  0x11   :  { %p490_p5 = scmp.ne.s32.totalorder %s29_s20, %s489_s21  ;;  %p495_p7 = scmp.lt.s32.totalorder %s489_s21, %s489_s21 }
  0x13   :  { %p496_p8 = por %p495_p7, %p494_p6 }
  0x15   :  { %p497_p9 = pnand %p496_p8, %p490_p5 }
  0x17   :  { %500 = shalt.err (!%p497_p9)
}
  0x18   :  { %s531_s22 = smov 128   ;;  %s532_s23 = smov 8  }
  0x19   :  { %34 = dma.hbm_to_vmem [thread:$0]  %s614_s1, 2048, %s29_s20, [#allocation6], %s531_s22, %s531_s22, %s532_s23  }
  0x1a   :  { %521 = dma.done.wait [#allocation3], 1024  }
  0x1b   :  { %522 = vsyncadd [#allocation3], 4294966272 }
  0x1c   :  { %523 = dma.done.wait [#allocation6], 2048  }
  0x1d   :  { %524 = vsyncadd [#allocation6], 4294965248  ;;  %v533_v0 = vmov 0   ;;  %v429_v1 = vld [vmem:[#allocation5 + $0x74] ss:$8 sps:$4 sm:$0xff]   ;;  %v453_v17 = vld [vmem:[#allocation2] sm:$0xff]   ;;  %v78_v25 = vlaneseq }
  0x1e   :  { %248 = vmatprep.mubr.bf16.mxu0 %v533_v0  ;;  %288 = vmatprep.mubr.bf16.mxu1 %v533_v0  ;;  %v431_v2 = vld [vmem:[#allocation5 + $0x70] ss:$8 sps:$4 sm:$0xff]   ;;  %v432_v3 = vld [vmem:[#allocation5 + $0x64] ss:$8 sps:$4 sm:$0xff]   ;;  %v434_v4 = vld [vmem:[#allocation5 + $0x60] ss:$8 sps:$4 sm:$0xff]  }
  0x1f   :  { %216 = vmatprep.subr.bf16.mxu0 %v429_v1  ;;  %403 = vmatprep.subr.bf16.mxu1 %v429_v1  ;;  %v435_v5 = vld [vmem:[#allocation5 + $0x54] ss:$8 sps:$4 sm:$0xff]   ;;  %v437_v6 = vld [vmem:[#allocation5 + $0x50] ss:$8 sps:$4 sm:$0xff]   ;;  %v438_v7 = vld [vmem:[#allocation5 + $0x44] ss:$8 sps:$4 sm:$0xff]  }
  0x20   :  { %217 = vmatpush1.bf16.msra.mxu0 %v431_v2  ;;  %411 = vmatpush1.bf16.msra.mxu1 %v431_v2  ;;  %v440_v8 = vld [vmem:[#allocation5 + $0x40] ss:$8 sps:$4 sm:$0xff]   ;;  %v441_v9 = vld [vmem:[#allocation5 + $0x34] ss:$8 sps:$4 sm:$0xff]   ;;  %v443_v10 = vld [vmem:[#allocation5 + $0x30] ss:$8 sps:$4 sm:$0xff]  }
  0x21   :  { %218 = vmatprep.subr.bf16.mxu0 %v432_v3  ;;  %404 = vmatprep.subr.bf16.mxu1 %v432_v3  ;;  %v444_v11 = vld [vmem:[#allocation5 + $0x24] ss:$8 sps:$4 sm:$0xff]   ;;  %v446_v12 = vld [vmem:[#allocation5 + $0x20] ss:$8 sps:$4 sm:$0xff]   ;;  %v447_v13 = vld [vmem:[#allocation5 + $0x14] ss:$8 sps:$4 sm:$0xff]  }
  0x22   :  { %v449_v14 = vld [vmem:[#allocation5 + $0x10] ss:$8 sps:$4 sm:$0xff]   ;;  %v450_v15 = vld [vmem:[#allocation5 + $0x4] ss:$8 sps:$4 sm:$0xff]   ;;  %v452_v16 = vld [vmem:[#allocation5] ss:$8 sps:$4 sm:$0xff]  }
  0x23   :  { %v454_v18 = vld [vmem:[#allocation2 + $0x20] sm:$0xff]   ;;  %v455_v19 = vld [vmem:[#allocation2 + $0x8] sm:$0xff]   ;;  %v457_v21 = vld [vmem:[#allocation2 + $0x10] sm:$0xff]   ;;  %v79_v26 = vshrl.u32 %v78_v25, 7 }
  0x24   :  { %219 = vmatpush1.bf16.msra.mxu0 %v434_v4  ;;  %412 = vmatpush1.bf16.msra.mxu1 %v434_v4  ;;  %v456_v20 = vld [vmem:[#allocation2 + $0x28] sm:$0xff]   ;;  %v458_v22 = vld [vmem:[#allocation2 + $0x30] sm:$0xff]   ;;  %v459_v23 = vld [vmem:[#allocation2 + $0x18] sm:$0xff]  }
  0x25   :  { %220 = vmatprep.subr.bf16.mxu0 %v435_v5  ;;  %405 = vmatprep.subr.bf16.mxu1 %v435_v5  ;;  %v460_v24 = vld [vmem:[#allocation2 + $0x38] sm:$0xff]   ;;  %v80_v27 = vsub.s32 0, %v79_v26  ;;  %v76_v28 = vld [vmem:[%s615_s2] sm:$0x3]  ;;  %v84_v29 = vsub.s32 1, %v79_v26  ;;  %s534_s2 = smov [#allocation7]  }
  0x26   :  { %s366_s26 = sshll.u32 %s534_s2, 4  ;;  %s367_s26 = int_to_ptr.vmem [resolvable:$true] %s366_s26 }
  0x27   :  { %v574_v30 = vrot.slane %v76_v28, %v80_v27  ;;  %v576_v31 = vrot.slane %v76_v28, %v84_v29  ;;  %s501_s27 = scalar_lea.vmem %s367_s26, 4096  ;;  %p506_p11 = scmp.lt.s32.totalorder %s367_s26, %s367_s26 }
  0x28   :  { %221 = vmatpush1.bf16.msra.mxu0 %v437_v6  ;;  %413 = vmatpush1.bf16.msra.mxu1 %v437_v6  ;;  %p502_p10 = scmp.ne.s32.totalorder %s367_s26, %s501_s27  ;;  %p507_p12 = scmp.lt.s32.totalorder %s501_s27, %s501_s27 }
  0x29   :  { %222 = vmatprep.subr.bf16.mxu0 %v438_v7  ;;  %406 = vmatprep.subr.bf16.mxu1 %v438_v7 }
  0x2a   :  { %p508_p13 = por %p507_p12, %p506_p11 }
  0x2c   :  { %223 = vmatpush1.bf16.msra.mxu0 %v440_v8  ;;  %414 = vmatpush1.bf16.msra.mxu1 %v440_v8  ;;  %p509_p0 = pnand %p508_p13, %p502_p10 }
  0x2d   :  { %224 = vmatprep.subr.bf16.mxu0 %v441_v9  ;;  %407 = vmatprep.subr.bf16.mxu1 %v441_v9 }
  0x30   :  { %225 = vmatpush1.bf16.msra.mxu0 %v443_v10  ;;  %415 = vmatpush1.bf16.msra.mxu1 %v443_v10 }
  0x31   :  { %226 = vmatprep.subr.bf16.mxu0 %v444_v11  ;;  %408 = vmatprep.subr.bf16.mxu1 %v444_v11 }
  0x34   :  { %227 = vmatpush1.bf16.msra.mxu0 %v446_v12  ;;  %416 = vmatpush1.bf16.msra.mxu1 %v446_v12 }
  0x35   :  { %228 = vmatprep.subr.bf16.mxu0 %v447_v13  ;;  %409 = vmatprep.subr.bf16.mxu1 %v447_v13 }
  0x38   :  { %229 = vmatpush1.bf16.msra.mxu0 %v449_v14  ;;  %417 = vmatpush1.bf16.msra.mxu1 %v449_v14 }
  0x39   :  { %230 = vmatprep.subr.bf16.mxu0 %v450_v15  ;;  %410 = vmatprep.subr.bf16.mxu1 %v450_v15 }
  0x3c   :  { %231 = vmatpush1.bf16.msra.mxu0 %v452_v16  ;;  %418 = vmatpush1.bf16.msra.mxu1 %v452_v16 }
  0x3f   :  { %249 = vmatmul.mubr.bf16.vlgmr.msra.gmra.mxu0 %v453_v17  ;;  %289 = vmatmul.mubr.bf16.vlgmr.msra.gmra.mxu1 %v454_v18 }
  0x40   :  { %258 = vmatprep.mubr.bf16.mxu0 %v533_v0  ;;  %298 = vmatprep.mubr.bf16.mxu1 %v533_v0 }
  0x47   :  { %259 = vmatmul.mubr.bf16.gmra.mxu0 %v455_v19  ;;  %299 = vmatmul.mubr.bf16.gmra.mxu1 %v456_v20 }
  0x48   :  { %268 = vmatprep.mubr.bf16.mxu0 %v533_v0  ;;  %308 = vmatprep.mubr.bf16.mxu1 %v533_v0 }
  0x4f   :  { %269 = vmatmul.mubr.bf16.gmra.mxu0 %v457_v21  ;;  %309 = vmatmul.mubr.bf16.gmra.mxu1 %v458_v22 }
  0x50   :  { %278 = vmatprep.mubr.bf16.mxu0 %v533_v0  ;;  %318 = vmatprep.mubr.bf16.mxu1 %v533_v0 }
  0x57   :  { %279 = vmatmul.mubr.bf16.gmra.mxu0 %v459_v23  ;;  %319 = vmatmul.mubr.bf16.gmra.mxu1 %v460_v24 }
  0xff   :  { %v250_v32 = vpop.f32.mrf.mxu0  ;;  %v290_v33 = vpop.f32.mrf.mxu1 }
 0x100   :  { %v251_v34 = vadd.f32 %v250_v32, %v574_v30  ;;  %v291_v35 = vadd.f32 %v290_v33, %v574_v30 }
 0x101   :  { %v252_v36 = vpop.f32.mrf.mxu0  ;;  %v292_v37 = vpop.f32.mrf.mxu1 }
 0x102   :  { %329 = vst [vmem:[#allocation7] sm:$0xff] %v251_v34  ;;  %345 = vst [vmem:[#allocation7 + $0x80] sm:$0xff] %v291_v35  ;;  %v253_v38 = vadd.f32 %v252_v36, %v576_v31  ;;  %v293_v39 = vadd.f32 %v292_v37, %v576_v31 }
 0x103   :  { %v254_v40 = vpop.f32.mrf.mxu0  ;;  %v294_v41 = vpop.f32.mrf.mxu1 }
 0x104   :  { %330 = vst [vmem:[#allocation7 + $0x8] sm:$0xff] %v253_v38  ;;  %346 = vst [vmem:[#allocation7 + $0x88] sm:$0xff] %v293_v39  ;;  %v255_v42 = vadd.f32 %v254_v40, %v574_v30  ;;  %v295_v43 = vadd.f32 %v294_v41, %v574_v30 }
 0x105   :  { %v256_v44 = vpop.f32.mrf.mxu0  ;;  %v296_v45 = vpop.f32.mrf.mxu1 }
 0x106   :  { %331 = vst [vmem:[#allocation7 + $0x10] sm:$0xff] %v255_v42  ;;  %347 = vst [vmem:[#allocation7 + $0x90] sm:$0xff] %v295_v43  ;;  %v257_v46 = vadd.f32 %v256_v44, %v576_v31  ;;  %v297_v47 = vadd.f32 %v296_v45, %v576_v31 }
 0x107   :  { %v260_v48 = vpop.f32.mrf.mxu0  ;;  %v300_v49 = vpop.f32.mrf.mxu1 }
 0x108   :  { %332 = vst [vmem:[#allocation7 + $0x18] sm:$0xff] %v257_v46  ;;  %348 = vst [vmem:[#allocation7 + $0x98] sm:$0xff] %v297_v47  ;;  %v261_v50 = vadd.f32 %v260_v48, %v574_v30  ;;  %v301_v51 = vadd.f32 %v300_v49, %v574_v30 }
 0x109   :  { %v262_v52 = vpop.f32.mrf.mxu0  ;;  %v302_v53 = vpop.f32.mrf.mxu1 }
 0x10a   :  { %333 = vst [vmem:[#allocation7 + $0x20] sm:$0xff] %v261_v50  ;;  %349 = vst [vmem:[#allocation7 + $0xa0] sm:$0xff] %v301_v51  ;;  %v263_v54 = vadd.f32 %v262_v52, %v576_v31  ;;  %v303_v55 = vadd.f32 %v302_v53, %v576_v31 }
 0x10b   :  { %v264_v56 = vpop.f32.mrf.mxu0  ;;  %v304_v57 = vpop.f32.mrf.mxu1 }
 0x10c   :  { %334 = vst [vmem:[#allocation7 + $0x28] sm:$0xff] %v263_v54  ;;  %350 = vst [vmem:[#allocation7 + $0xa8] sm:$0xff] %v303_v55  ;;  %v265_v58 = vadd.f32 %v264_v56, %v574_v30  ;;  %v305_v59 = vadd.f32 %v304_v57, %v574_v30 }
 0x10d   :  { %v266_v60 = vpop.f32.mrf.mxu0  ;;  %v306_v61 = vpop.f32.mrf.mxu1 }
 0x10e   :  { %335 = vst [vmem:[#allocation7 + $0x30] sm:$0xff] %v265_v58  ;;  %351 = vst [vmem:[#allocation7 + $0xb0] sm:$0xff] %v305_v59  ;;  %v267_v62 = vadd.f32 %v266_v60, %v576_v31  ;;  %v307_v63 = vadd.f32 %v306_v61, %v576_v31 }
 0x10f   :  { %v270_v0 = vpop.f32.mrf.mxu0  ;;  %v310_v1 = vpop.f32.mrf.mxu1 }
 0x110   :  { %336 = vst [vmem:[#allocation7 + $0x38] sm:$0xff] %v267_v62  ;;  %352 = vst [vmem:[#allocation7 + $0xb8] sm:$0xff] %v307_v63  ;;  %v271_v2 = vadd.f32 %v270_v0, %v574_v30  ;;  %v311_v3 = vadd.f32 %v310_v1, %v574_v30 }
 0x111   :  { %v272_v4 = vpop.f32.mrf.mxu0  ;;  %v312_v5 = vpop.f32.mrf.mxu1 }
 0x112   :  { %337 = vst [vmem:[#allocation7 + $0x40] sm:$0xff] %v271_v2  ;;  %353 = vst [vmem:[#allocation7 + $0xc0] sm:$0xff] %v311_v3  ;;  %v273_v6 = vadd.f32 %v272_v4, %v576_v31  ;;  %v313_v7 = vadd.f32 %v312_v5, %v576_v31 }
 0x113   :  { %v274_v8 = vpop.f32.mrf.mxu0  ;;  %v314_v9 = vpop.f32.mrf.mxu1 }
 0x114   :  { %338 = vst [vmem:[#allocation7 + $0x48] sm:$0xff] %v273_v6  ;;  %354 = vst [vmem:[#allocation7 + $0xc8] sm:$0xff] %v313_v7  ;;  %v275_v10 = vadd.f32 %v274_v8, %v574_v30  ;;  %v315_v11 = vadd.f32 %v314_v9, %v574_v30 }
 0x115   :  { %v276_v12 = vpop.f32.mrf.mxu0  ;;  %v316_v13 = vpop.f32.mrf.mxu1 }
 0x116   :  { %339 = vst [vmem:[#allocation7 + $0x50] sm:$0xff] %v275_v10  ;;  %355 = vst [vmem:[#allocation7 + $0xd0] sm:$0xff] %v315_v11  ;;  %v277_v14 = vadd.f32 %v276_v12, %v576_v31  ;;  %v317_v15 = vadd.f32 %v316_v13, %v576_v31 }
 0x117   :  { %v280_v16 = vpop.f32.mrf.mxu0  ;;  %v320_v17 = vpop.f32.mrf.mxu1 }
 0x118   :  { %340 = vst [vmem:[#allocation7 + $0x58] sm:$0xff] %v277_v14  ;;  %356 = vst [vmem:[#allocation7 + $0xd8] sm:$0xff] %v317_v15  ;;  %v281_v18 = vadd.f32 %v280_v16, %v574_v30  ;;  %v321_v19 = vadd.f32 %v320_v17, %v574_v30 }
 0x119   :  { %v282_v20 = vpop.f32.mrf.mxu0  ;;  %v322_v21 = vpop.f32.mrf.mxu1 }
 0x11a   :  { %341 = vst [vmem:[#allocation7 + $0x60] sm:$0xff] %v281_v18  ;;  %357 = vst [vmem:[#allocation7 + $0xe0] sm:$0xff] %v321_v19  ;;  %v283_v22 = vadd.f32 %v282_v20, %v576_v31  ;;  %v323_v23 = vadd.f32 %v322_v21, %v576_v31 }
 0x11b   :  { %v284_v24 = vpop.f32.mrf.mxu0  ;;  %v324_v25 = vpop.f32.mrf.mxu1 }
 0x11c   :  { %342 = vst [vmem:[#allocation7 + $0x68] sm:$0xff] %v283_v22  ;;  %358 = vst [vmem:[#allocation7 + $0xe8] sm:$0xff] %v323_v23  ;;  %v285_v26 = vadd.f32 %v284_v24, %v574_v30  ;;  %v325_v27 = vadd.f32 %v324_v25, %v574_v30 }
 0x11d   :  { %v286_v28 = vpop.f32.mrf.mxu0  ;;  %v326_v29 = vpop.f32.mrf.mxu1 }
 0x11e   :  { %343 = vst [vmem:[#allocation7 + $0x70] sm:$0xff] %v285_v26  ;;  %359 = vst [vmem:[#allocation7 + $0xf0] sm:$0xff] %v325_v27  ;;  %v287_v32 = vadd.f32 %v286_v28, %v576_v31  ;;  %v327_v33 = vadd.f32 %v326_v29, %v576_v31 }
 0x120   :  { %344 = vst [vmem:[#allocation7 + $0x78] sm:$0xff] %v287_v32  ;;  %360 = vst [vmem:[#allocation7 + $0xf8] sm:$0xff] %v327_v33 }
 0x121   :  { %512 = shalt.err (!%p509_p0)
}
 0x122   :  { %s535_s28 = smov 256   ;;  %s536_s29 = smov 16  }
 0x123   :  { %372 = dma.vmem_to_hbm [thread:$0]  %s367_s26, 4096, %s616_s3, [#allocation4], %s535_s28, %s535_s28, %s536_s29  }
 0x124   :  { %525 = dma.done.wait [#allocation4], 4096  }
 0x125   :  { %526 = vsyncadd [#allocation4], 4294963200 }
 0x126   :  { %376 = vsyncpa [#allocation3], 1 }
 0x127   :  { %377 = vsyncpa [#allocation6], 1 }
 0x128   :  { %378 = vsyncpa [#allocation4], 1 }

</bundles_post_ra>
